<compile_context>
chip_gen: v7x
topology: tpu7x:2x2x1
jax: 0.10.0
libtpu: 0.0.40
codegen_flags: <defaults>
</compile_context>

<pallas_src>
import functools

import jax
import jax.numpy as jnp
from jax.experimental import pallas as pl
from jax.experimental.pallas import tpu as pltpu

IGNORE_INDEX = -100                            # torch.nn.CrossEntropyLoss default
_M_FLOOR = float(jnp.finfo(jnp.float32).min)   # finite floor for the running max


def _vmem_capacity_bytes():
    """Physical VMEM per TensorCore (generation-aware); conservative fallback."""
    try:
        info = pltpu.get_tpu_info()
        cap = int(getattr(info, "vmem_capacity_bytes", 0) or 0)
        if cap > 0:
            return cap
    except Exception:
        pass
    return 64 * 1024 * 1024                    # v7x-sized fallback (safe everywhere)


def _round_down(x, m):
    return (x // m) * m


def _sublane_align(itemsize):
    return {4: 8, 2: 16, 1: 32}.get(itemsize, 8)


def _auto_tiles(batch, seq, n_classes, itemsize, vmem_cap):
    """Pick (ts, tc) so the logits block is ~4 MiB (v7x) / ~8 MiB (v5e/v6e)."""
    align_s = _sublane_align(itemsize)
    blk_target = (4 << 20) if vmem_cap <= (64 << 20) else (8 << 20)

    ts = min(seq, 512 if itemsize <= 2 else 256)
    if ts < seq:
        ts = max(align_s, _round_down(ts, align_s))
    # Megacore (v7x: 2 TCs): keep >= 2 parallel (B, S) grid steps when possible;
    # prefer growing tc (below) rather than ts once this bites.
    while ts > align_s and batch * ((seq + ts - 1) // ts) < 2:
        ts = max(align_s, _round_down(max(ts // 2, align_s), align_s))

    tc_target = max(512, blk_target // max(1, ts * itemsize))
    if n_classes <= tc_target:
        tc = n_classes
    else:
        tc = max(128, _round_down(tc_target, 128))
    return ts, tc


def _pick_chunk(tc):
    """Lane width of the in-kernel fused pass; must divide tc."""
    for c in (512, 256, 128):
        if tc % c == 0:
            return c
    return tc


def _ce_per_position_kernel(x_ref, t_ref, o_ref, m_sc, l_sc, tl_sc, *,
                            chunk, num_classes, mask_tail):
    """One grid step = one (batch, S-tile, C-tile) block.

    x_ref : (TS, TC) logits, native dtype (bf16/f32)
    t_ref : (TS, 1)  int32 target class ids
    o_ref : (TS, 1)  f32 per-position loss (written on the last C step only)
    m_sc  : (TS, 1)  f32 running max          (online logsumexp)
    l_sc  : (TS, 1)  f32 running exp-sum
    tl_sc : (TS, 1)  f32 running target logit
    """
    ts, tc = x_ref.shape
    c_idx = pl.program_id(2)
    n_c = pl.num_programs(2)

    @pl.when(c_idx == 0)
    def _():
        m_sc[...] = jnp.full(m_sc.shape, _M_FLOOR, dtype=jnp.float32)
        l_sc[...] = jnp.zeros(l_sc.shape, dtype=jnp.float32)
        tl_sc[...] = jnp.zeros(tl_sc.shape, dtype=jnp.float32)

    tgt = t_ref[...]                                         # (TS, 1) int32
    tile_base = c_idx * tc
    n_chunks = tc // chunk
    lane_iota = jax.lax.broadcasted_iota(jnp.int32, (1, chunk), 1)  # hoisted

    def chunk_body(i, carry):
        m_prev, l_prev, tl_prev = carry
        off = pl.multiple_of(i * chunk, chunk)
        # Single fused pass over this sub-chunk: the bf16/f32 data is read from
        # VMEM exactly once and upcast in-register; no full-tile f32 copy, exp
        # or mask intermediate is ever materialized.
        lg = x_ref[:, pl.ds(off, chunk)].astype(jnp.float32)          # (TS, chunk)
        cls = lane_iota + (tile_base + off)                           # (1, chunk)
        if mask_tail:
            lg = jnp.where(cls < num_classes, lg, -jnp.inf)
        m_new = jnp.maximum(m_prev, jnp.max(lg, axis=-1, keepdims=True))
        alpha = jnp.exp(m_prev - m_new)                               # (TS, 1)
        p_sum = jnp.sum(jnp.exp(lg - m_new), axis=-1, keepdims=True)  # XLU reduce
        l_new = alpha * l_prev + p_sum
        hit = cls == tgt                                              # (TS, chunk)
        tl_new = tl_prev + jnp.sum(jnp.where(hit, lg, 0.0), axis=-1,
                                   keepdims=True)
        return m_new, l_new, tl_new

    m, l, tl = jax.lax.fori_loop(
        0, n_chunks, chunk_body, (m_sc[...], l_sc[...], tl_sc[...]), unroll=True)
    m_sc[...] = m
    l_sc[...] = l
    tl_sc[...] = tl

    @pl.when(c_idx == n_c - 1)
    def _():
        lse = jnp.log(l) + m                                  # (TS, 1)
        loss = lse - tl
        # ignore_index positions contribute 0 loss (reduction='none').
        o_ref[...] = jnp.where(tgt != IGNORE_INDEX, loss, 0.0)


@functools.partial(jax.jit, static_argnames=("ts", "tc"))
def cross_entropy_loss_per_position(logits, target, *, ts=None, tc=None):
    """logits: (B, S, C) float (bf16/f32); target: (B, S) int. Returns (S, B) f32."""
    B, S, C = logits.shape
    itemsize = jnp.dtype(logits.dtype).itemsize
    align_s = _sublane_align(itemsize)
    vmem_cap = _vmem_capacity_bytes()

    auto_ts, auto_tc = _auto_tiles(B, S, C, itemsize, vmem_cap)
    ts = auto_ts if ts is None else int(ts)
    tc = auto_tc if tc is None else int(tc)

    # Sanitize tiles so they always satisfy TPU block-shape constraints.
    ts = min(ts, S)
    if ts < S:
        ts = max(align_s, _round_down(ts, align_s))
    tc = min(tc, C)
    if tc < C:
        tc = min(C, max(128, _round_down(tc, 128)))
    mask_tail = (C % tc) != 0
    chunk = _pick_chunk(tc)

    tgt3 = target.astype(jnp.int32).reshape(B, S, 1)

    # VMEM budget: double-buffered logits stream + fused-pass chunk temporaries
    # (upper bound) + tiny target/output blocks + accumulators + headroom.
    est = (2 * ts * tc * itemsize
           + 8 * ts * chunk * 4
           + 32 * ts * 4
           + (2 << 20))
    cap = vmem_cap - (4 << 20)
    if est > cap:
        raise ValueError(
            f"Tiles ts={ts}, tc={tc} need ~{est >> 20} MiB VMEM but only "
            f"~{cap >> 20} MiB is available on this TPU; pass smaller ts/tc.")
    vmem_limit = int(min(cap, max(2 * est, 32 * 1024 * 1024)))

    grid = (B, pl.cdiv(S, ts), pl.cdiv(C, tc))
    kernel = functools.partial(_ce_per_position_kernel, chunk=chunk,
                               num_classes=C, mask_tail=mask_tail)

    out = pl.pallas_call(
        kernel,
        out_shape=jax.ShapeDtypeStruct((B, S, 1), jnp.float32),
        grid_spec=pltpu.PrefetchScalarGridSpec(
            num_scalar_prefetch=0,
            grid=grid,
            in_specs=[
                pl.BlockSpec((None, ts, tc), lambda b, s, c: (b, s, c)),
                pl.BlockSpec((None, ts, 1), lambda b, s, c: (b, s, 0)),
            ],
            out_specs=pl.BlockSpec((None, ts, 1), lambda b, s, c: (b, s, 0)),
            scratch_shapes=[
                pltpu.VMEM((ts, 1), jnp.float32),   # running max
                pltpu.VMEM((ts, 1), jnp.float32),   # running exp-sum
                pltpu.VMEM((ts, 1), jnp.float32),   # running target logit
            ],
        ),
        compiler_params=pltpu.CompilerParams(
            dimension_semantics=("parallel", "parallel", "arbitrary"),
            vmem_limit_bytes=vmem_limit,
        ),
    )(logits, tgt3)

    # (B, S, 1) -> (S, B); output traffic is C-times smaller than the input
    # stream, so this XLA transpose is negligible.
    return out[..., 0].T


def _reference(logits, target):
    """Pure-JAX reference (same f32 math the kernel performs)."""
    lg = logits.astype(jnp.float32)
    lse = jax.nn.logsumexp(lg, axis=-1)                                # (B, S)
    tgt_logit = jnp.take_along_axis(
        lg, jnp.clip(target, 0, lg.shape[-1] - 1)[..., None], axis=-1)[..., 0]
    loss = jnp.where(target != IGNORE_INDEX, lse - tgt_logit, 0.0)
    return loss.T                                                      # (S, B)


def _check(logits, target, **kw):
    out = jax.block_until_ready(cross_entropy_loss_per_position(logits, target, **kw))
    ref = _reference(logits, target)
    assert out.shape == ref.shape, (out.shape, ref.shape)
    assert jnp.allclose(out, ref, atol=1e-4, rtol=1e-4), (out, ref)
    return out


if __name__ == "__main__":
    key = jax.random.PRNGKey(0)

    # 1) bf16 logits, explicit tiles: exercises S tiling + multi-step online
    #    logsumexp across C tiles + ignore_index (divisible shapes).
    B, S, C = 2, 32, 256
    k1, k2, key = jax.random.split(key, 3)
    logits = jax.random.normal(k1, (B, S, C), dtype=jnp.float32).astype(jnp.bfloat16)
    target = jax.random.randint(k2, (B, S), 0, C, dtype=jnp.int32)
    target = target.at[0, 3].set(IGNORE_INDEX)
    _check(logits, target, ts=16, tc=128)

    # 2) Same inputs through the auto-tile (generation-aware) path.
    _check(logits, target)

    # 3) f32 logits with a vocab that is not a multiple of 128: exercises the
    #    cdiv grid + tail-lane masking path (no pad copy of the logits).
    B, S, C = 2, 32, 200
    k1, k2, key = jax.random.split(key, 3)
    logits = jax.random.normal(k1, (B, S, C), dtype=jnp.float32)
    target = jax.random.randint(k2, (B, S), 0, C, dtype=jnp.int32)
    target = target.at[1, 5].set(IGNORE_INDEX)
    _check(logits, target, ts=16, tc=128)

    print("KERNEL_OK")
</pallas_src>

<mosaic_0001>
module attributes {stable_mosaic.version = 11 : i64} {
  func.func @_ce_per_position_kernel(%arg0: i32, %arg1: i32, %arg2: i32, %arg3: memref<1x16x128xbf16, #tpu.memory_space<vmem>>, %arg4: memref<1x16x1xi32, #tpu.memory_space<vmem>>, %arg5: memref<1x16x1xf32, #tpu.memory_space<vmem>>, %arg6: memref<16x1xf32, #tpu.memory_space<vmem>>, %arg7: memref<16x1xf32, #tpu.memory_space<vmem>>, %arg8: memref<16x1xf32, #tpu.memory_space<vmem>>) attributes {dimension_semantics = [#tpu.dimension_semantics<parallel>, #tpu.dimension_semantics<parallel>, #tpu.dimension_semantics<arbitrary>], iteration_bounds = array<i64: 2, 2, 2>, scalar_prefetch = 0 : i64, scratch_operands = 3 : i64, tpu.core_type = #tpu.core_type<tc>, window_params = [{transform_indices = @transform_0, window_bounds = array<i64: 1, 16, 128>}, {transform_indices = @transform_1, window_bounds = array<i64: 1, 16, 1>}, {transform_indices = @transform_2, window_bounds = array<i64: 1, 16, 1>}]} {
    %c0_i32 = arith.constant 0 : i32
    %0 = arith.cmpi eq, %arg2, %c0_i32 : i32
    %1 = arith.extui %0 : i1 to i32
    %c0_i32_0 = arith.constant 0 : i32
    %2 = arith.cmpi ne, %1, %c0_i32_0 : i32
    scf.if %2 {
      %cst_24 = arith.constant -3.40282347E+38 : f32
      %45 = vector.broadcast %cst_24 : f32 to vector<16x1xf32>
      %c0_25 = arith.constant 0 : index
      %c0_26 = arith.constant 0 : index
      %46 = vector.load %arg6[%c0_25, %c0_26] : memref<16x1xf32, #tpu.memory_space<vmem>>, vector<16x1xf32>
      tpu.vector_store %arg6[%c0_25, %c0_26], %45 {strides = array<i32>} : memref<16x1xf32, #tpu.memory_space<vmem>>, vector<16x1xf32>,
      %cst_27 = arith.constant 0.000000e+00 : f32
      %47 = vector.broadcast %cst_27 : f32 to vector<16x1xf32>
      %c0_28 = arith.constant 0 : index
      %c0_29 = arith.constant 0 : index
      %48 = vector.load %arg7[%c0_28, %c0_29] : memref<16x1xf32, #tpu.memory_space<vmem>>, vector<16x1xf32>
      tpu.vector_store %arg7[%c0_28, %c0_29], %47 {strides = array<i32>} : memref<16x1xf32, #tpu.memory_space<vmem>>, vector<16x1xf32>,
      %cst_30 = arith.constant 0.000000e+00 : f32
      %49 = vector.broadcast %cst_30 : f32 to vector<16x1xf32>
      %c0_31 = arith.constant 0 : index
      %c0_32 = arith.constant 0 : index
      %50 = vector.load %arg8[%c0_31, %c0_32] : memref<16x1xf32, #tpu.memory_space<vmem>>, vector<16x1xf32>
      tpu.vector_store %arg8[%c0_31, %c0_32], %49 {strides = array<i32>} : memref<16x1xf32, #tpu.memory_space<vmem>>, vector<16x1xf32>,
    } else {
    }
    %c0 = arith.constant 0 : index
    %c0_1 = arith.constant 0 : index
    %c0_2 = arith.constant 0 : index
    %3 = vector.load %arg4[%c0, %c0_1, %c0_2] : memref<1x16x1xi32, #tpu.memory_space<vmem>>, vector<1x16x1xi32>
    %4 = vector.shape_cast %3 : vector<1x16x1xi32> to vector<16x1xi32>
    %c128_i32 = arith.constant 128 : i32
    %5 = arith.muli %arg2, %c128_i32 : i32
    %6 = tpu.iota {dimensions = array<i32: 1>} : vector<1x128xi32>
    %c0_3 = arith.constant 0 : index
    %c0_4 = arith.constant 0 : index
    %7 = vector.load %arg6[%c0_3, %c0_4] : memref<16x1xf32, #tpu.memory_space<vmem>>, vector<16x1xf32>
    %c0_5 = arith.constant 0 : index
    %c0_6 = arith.constant 0 : index
    %8 = vector.load %arg7[%c0_5, %c0_6] : memref<16x1xf32, #tpu.memory_space<vmem>>, vector<16x1xf32>
    %c0_7 = arith.constant 0 : index
    %c0_8 = arith.constant 0 : index
    %9 = vector.load %arg8[%c0_7, %c0_8] : memref<16x1xf32, #tpu.memory_space<vmem>>, vector<16x1xf32>
    %c0_i32_9 = arith.constant 0 : i32
    %c128_i32_10 = arith.constant 128 : i32
    %10 = arith.muli %c0_i32_9, %c128_i32_10 : i32
    %11 = tpu.assume_multiple %10, 128 : i32
    %c0_11 = arith.constant 0 : index
    %c0_12 = arith.constant 0 : index
    %12 = arith.index_cast %11 : i32 to index
    %13 = vector.load %arg3[%c0_11, %c0_12, %12] : memref<1x16x128xbf16, #tpu.memory_space<vmem>>, vector<1x16x128xbf16>
    %14 = vector.shape_cast %13 : vector<1x16x128xbf16> to vector<16x128xbf16>
    %15 = arith.extf %14 : vector<16x128xbf16> to vector<16x128xf32>
    %16 = arith.addi %5, %11 : i32
    %17 = vector.broadcast %16 : i32 to vector<1x128xi32>
    %18 = arith.addi %6, %17 : vector<1x128xi32>
    %cst = arith.constant dense<0xFF800000> : vector<16xf32>
    %19 = vector.multi_reduction <maximumf>, %15, %cst [1] : vector<16x128xf32> to vector<16xf32>
    %20 = vector.shape_cast %19 : vector<16xf32> to vector<16x1xf32>
    %21 = arith.maximumf %7, %20 : vector<16x1xf32>
    %22 = arith.subf %7, %21 : vector<16x1xf32>
    %23 = math.exp %22 : vector<16x1xf32>
    %24 = vector.broadcast %21 : vector<16x1xf32> to vector<16x128xf32>
    %25 = arith.subf %15, %24 : vector<16x128xf32>
    %26 = math.exp %25 : vector<16x128xf32>
    %cst_13 = arith.constant dense<0.000000e+00> : vector<16xf32>
    %27 = vector.multi_reduction <add>, %26, %cst_13 [1] : vector<16x128xf32> to vector<16xf32>
    %28 = vector.shape_cast %27 : vector<16xf32> to vector<16x1xf32>
    %29 = arith.mulf %23, %8 : vector<16x1xf32>
    %30 = arith.addf %29, %28 : vector<16x1xf32>
    %31 = vector.broadcast %18 : vector<1x128xi32> to vector<16x128xi32>
    %32 = vector.broadcast %4 : vector<16x1xi32> to vector<16x128xi32>
    %33 = arith.cmpi eq, %31, %32 : vector<16x128xi32>
    %cst_14 = arith.constant 0.000000e+00 : f32
    %34 = vector.broadcast %cst_14 : f32 to vector<16x128xf32>
    %35 = arith.select %33, %15, %34 : vector<16x128xi1>, vector<16x128xf32>
    %cst_15 = arith.constant dense<0.000000e+00> : vector<16xf32>
    %36 = vector.multi_reduction <add>, %35, %cst_15 [1] : vector<16x128xf32> to vector<16xf32>
    %37 = vector.shape_cast %36 : vector<16xf32> to vector<16x1xf32>
    %38 = arith.addf %9, %37 : vector<16x1xf32>
    %c1_i32 = arith.constant 1 : i32
    %c0_16 = arith.constant 0 : index
    %c0_17 = arith.constant 0 : index
    %39 = vector.load %arg6[%c0_16, %c0_17] : memref<16x1xf32, #tpu.memory_space<vmem>>, vector<16x1xf32>
    tpu.vector_store %arg6[%c0_16, %c0_17], %21 {strides = array<i32>} : memref<16x1xf32, #tpu.memory_space<vmem>>, vector<16x1xf32>,
    %c0_18 = arith.constant 0 : index
    %c0_19 = arith.constant 0 : index
    %40 = vector.load %arg7[%c0_18, %c0_19] : memref<16x1xf32, #tpu.memory_space<vmem>>, vector<16x1xf32>
    tpu.vector_store %arg7[%c0_18, %c0_19], %30 {strides = array<i32>} : memref<16x1xf32, #tpu.memory_space<vmem>>, vector<16x1xf32>,
    %c0_20 = arith.constant 0 : index
    %c0_21 = arith.constant 0 : index
    %41 = vector.load %arg8[%c0_20, %c0_21] : memref<16x1xf32, #tpu.memory_space<vmem>>, vector<16x1xf32>
    tpu.vector_store %arg8[%c0_20, %c0_21], %38 {strides = array<i32>} : memref<16x1xf32, #tpu.memory_space<vmem>>, vector<16x1xf32>,
    %c1_i32_22 = arith.constant 1 : i32
    %42 = arith.cmpi eq, %arg2, %c1_i32_22 : i32
    %43 = arith.extui %42 : i1 to i32
    %c0_i32_23 = arith.constant 0 : i32
    %44 = arith.cmpi ne, %43, %c0_i32_23 : i32
    scf.if %44 {
      %45 = math.log %30 : vector<16x1xf32>
      %46 = arith.addf %45, %21 : vector<16x1xf32>
      %47 = arith.subf %46, %38 : vector<16x1xf32>
      %c-100_i32 = arith.constant -100 : i32
      %48 = vector.broadcast %c-100_i32 : i32 to vector<16x1xi32>
      %49 = arith.cmpi ne, %4, %48 : vector<16x1xi32>
      %cst_24 = arith.constant 0.000000e+00 : f32
      %50 = vector.broadcast %cst_24 : f32 to vector<16x1xf32>
      %51 = arith.select %49, %47, %50 : vector<16x1xi1>, vector<16x1xf32>
      %c0_25 = arith.constant 0 : index
      %c0_26 = arith.constant 0 : index
      %c0_27 = arith.constant 0 : index
      %52 = vector.load %arg5[%c0_25, %c0_26, %c0_27] : memref<1x16x1xf32, #tpu.memory_space<vmem>>, vector<1x16x1xf32>
      %53 = vector.shape_cast %52 : vector<1x16x1xf32> to vector<16x1xf32>
      %54 = vector.shape_cast %51 : vector<16x1xf32> to vector<1x16x1xf32>
      tpu.vector_store %arg5[%c0_25, %c0_26, %c0_27], %54 {strides = array<i32>} : memref<1x16x1xf32, #tpu.memory_space<vmem>>, vector<1x16x1xf32>,
    } else {
    }
    return
  }
  func.func @transform_0(%arg0: i32, %arg1: i32, %arg2: i32) -> (i32, i32, i32) {
    %c0_i32 = arith.constant 0 : i32
    return %arg0, %arg1, %arg2 : i32, i32, i32
  }
  func.func @transform_1(%arg0: i32, %arg1: i32, %arg2: i32) -> (i32, i32, i32) {
    %c0_i32 = arith.constant 0 : i32
    %c0_i32_0 = arith.constant 0 : i32
    return %arg0, %arg1, %c0_i32 : i32, i32, i32
  }
  func.func @transform_2(%arg0: i32, %arg1: i32, %arg2: i32) -> (i32, i32, i32) {
    %c0_i32 = arith.constant 0 : i32
    %c0_i32_0 = arith.constant 0 : i32
    return %arg0, %arg1, %c0_i32 : i32, i32, i32
  }
}

</mosaic_0001>

<bundles_post_ra>
// kernel: cross_entropy_loss_per_position.1
= control target key start
LH: loop header
LB: loop body
LE: loop exit
PB: predicated region body
PF: predicated region fallthrough
CT: control target
= control target key end

     0   :  { %s695_s9 = smov 0   ;;  %s697_s10 = smov 0   ;;  %s856_s0 = inlined_call_operand.vmem [shape: bf16[2,32,256], index: 0, kind: input, shape index: {}]   ;;  %s857_s1 = inlined_call_operand.vmem [shape: s32[2,32,1], index: 1, kind: input, shape index: {}]   ;;  %s858_s2 = inlined_call_operand.vmem [shape: f32[2,32,1], index: 2, kind: output, shape index: {}]  }
   0x1   :  { %s699_s11 = smov 0   ;;  %s701_s12 = smov 0  }
   0x2   :  { %s703_s13 = smov 0   ;;  %s705_s14 = smov 0  }
   0x3   :  { %s707_s15 = smov 0   ;;  %s709_s16 = smov 0  }
   0x4   :  { %s711_s17 = smov 0  }
   0x5 LB: > { %s24_s18 = sadd.s32 1, %s663_s14  ;;  %s27_s19 = sadd.s32 1, %s667_s15  ;;  %s675_s17 = sphi %s711_s17, %s12_s17   ;;  %s671_s16 = sphi %s709_s16, %s867_s16   ;;  %s667_s15 = sphi %s707_s15, %s866_s15   ;;  %s663_s14 = sphi %s705_s14, %s865_s14   ;;  %s659_s13 = sphi %s703_s13, %s864_s13   ;;  %s655_s12 = sphi %s701_s12, %s863_s12   ;;  %s651_s11 = sphi %s699_s11, %s862_s11   ;;  %s647_s10 = sphi %s697_s10, %s861_s10   ;;  %s643_s9 = sphi %s695_s9, %s860_s9  }
   0x6   : > { %p25_p0 = scmp.ge.s32.totalorder %s24_s18, 2  ;;  %p49_p1 = scmp.ne.s32.totalorder %s647_s10, %s643_s9 }
   0x7   : > { %p50_p2 = scmp.eq.s32.totalorder %s675_s17, 0  ;;  %s31_s20 = sadd.s32 1, %s671_s16 }
   0x8   : > { %s869_s19 = smov (!%p25_p0, %s27_s19), %s667_s15  ;;  %s875_s18 = smov (%p25_p0, %s24_s18), 0 }
   0x9   : > { %p29_p3 = scmp.ge.s32.totalorder %s869_s19, 2  ;;  %p747_p4 = por %p50_p2, %p49_p1 }
   0xa   : > { %s38_s23 = ssub.s32 %s663_s14, %s875_s18  ;;  %s42_s27 = sadd.s32 1, %s647_s10 }
   0xb   : > { %s871_s19 = smov (%p29_p3, %s869_s19), 0  ;;  %s873_s20 = smov (!%p29_p3, %s31_s20), %s671_s16 }
   0xc   : > { %p33_p5 = scmp.ge.s32.totalorder %s873_s20, 2  ;;  %s36_s22 = ssub.s32 %s667_s15, %s871_s19 }
   0xd   : > { %p492_p7 = scmp.ge.s32.totalorder %s675_s17, 8 }
   0xe   : > { %s877_s20 = smov (%p33_p5, %s873_s20), 0 }
   0xf   : > { %s35_s24 = ssub.s32 %s671_s16, %s877_s20  ;;  %131 = sbr.rel (%p492_p7) target bundleno = 30 (0x1e), region = 16 }
  0x10   : > { %s37_s25 = sor.u32 %s36_s22, %s35_s24 }
  0x11   : > { %s39_s26 = sor.u32 %s38_s23, %s37_s25 }
  0x12   : > { %p40_p6 = scmp.eq.s32.totalorder %s39_s26, 0 }
  0x14   : > { %s766_s28 = scalar_select %p40_p6, %s647_s10, %s42_s27  }
  0x16   : > { %134 = sbr.rel (!%p747_p4) target bundleno = 30 (0x1e), region = 20  ;;  %s136_s29 = sand.u32 (%p747_p4), 1, %s647_s10  }
  0x17   : > { %s511_s30 = sshll.u32 (%p747_p4), %s667_s15, 2  ;;  %s493_s3 = sshll.u32 (%p747_p4), %s136_s29, 3 }
  0x18   : > { %s141_s4 = sadd.s32 (%p747_p4), %s663_s14, %s511_s30  ;;  %s496_s5 = sshll.u32 (%p747_p4), %s671_s16, 3 }
  0x19   : > { %s143_s6 = sadd.s32 (%p747_p4), %s496_s5, %s141_s4  ;;  %s138_s24 = scalar_lea.vmem (%p747_p4), [#allocation5], %s493_s3 }
  0x1a   : > { %s497_s7 = sshll.u32 (%p747_p4), %s143_s6, 2 }
  0x1b   : > { %s145_s23 = scalar_lea.vmem (%p747_p4), %s856_s0, %s497_s7 }
  0x1c   : > { %v161_v0 = vld [vmem:[%s145_s23] sm:$0xf] (%p747_p4)  ;;  %v163_v1 = vld [vmem:[%s145_s23 + $0x8] sm:$0xf] (%p747_p4) }
  0x1d   : > { %162 = vst [vmem:[%s138_s24] sm:$0xf] %v161_v0  ;;  %164 = vst [vmem:[%s138_s24 + $0x4] sm:$0xf] %v163_v1 }
  0x1e PF: > { %p498_p8 = scmp.ge.s32.totalorder %s675_s17, 1  ;;  %p203_p9 = scmp.lt.s32.totalorder %s675_s17, 9 }
  0x20   : > { %p204_p10 = pnand %p498_p8, %p203_p9 }
  0x21   : > { %s210_s21 = sand.u32 (!%p204_p10), 1, %s643_s9   ;;  %s500_s25 = sshll.u32 (!%p204_p10), %s655_s12, 1 }
  0x22   : > { %207 = sbr.rel (%p204_p10) target bundleno = 506 (0x1fa), region = 65  ;;  %s499_s26 = sshll.u32 (!%p204_p10), %s210_s21, 3 }
  0x23   : > { %p246_p11 = scmp.lt.s32.totalorder (!%p204_p10), %s659_s13, 1  ;;  %p248_p12 = scmp.lt.s32.totalorder (!%p204_p10), %s500_s25, 3 }
  0x24   : > { %s212_s9 = scalar_lea.vmem (!%p204_p10), [#allocation5], %s499_s26  ;;  %p506_p13 = scmp.ne.s32.totalorder (!%p204_p10), %s651_s11, 0 }
  0x29   : > { %s879_s13 = smov (!%p246_p11, %s659_s13), 1  ;;  %s881_s25 = smov (!%p248_p12, %s500_s25), 3 }
  0x2a   : > { %s501_s27 = sshll.u32 %s879_s13, 2  ;;  %268 = sbr.rel (%p506_p13) target bundleno = 49 (0x31), region = 73  ;;  %vm269_vm0 = vcmask (!%p506_p13), 7168   ;;  %v677_v2 = vmov (!%p506_p13), -3.4028235e+38   ;;  %v678_v3 = vmov (!%p506_p13), 0.0  }
  0x2b   : > { %s251_s29 = sadd.s32 %s501_s27, %s881_s25  ;;  %270 = vst.msk [vmem:[#allocation2] sm:$0xff] (!%p506_p13), %vm269_vm0, %v677_v2  ;;  %271 = vst.msk [vmem:[#allocation2 + $0x8] sm:$0xff] (!%p506_p13), %vm269_vm0, %v677_v2 }
  0x2c   : > { %s502_s30 = sshll.u32 %s251_s29, 3  ;;  %272 = vst.msk [vmem:[#allocation3] sm:$0xff] (!%p506_p13), %vm269_vm0, %v678_v3  ;;  %273 = vst.msk [vmem:[#allocation3 + $0x8] sm:$0xff] (!%p506_p13), %vm269_vm0, %v678_v3 }
  0x2d   : > { %s787_s5 = scalar_lea.vmem %s857_s1, %s502_s30  ;;  %s792_s8 = scalar_lea.vmem %s858_s2, %s502_s30  ;;  %274 = vst.msk [vmem:[#allocation4] sm:$0xff] (!%p506_p13), %vm269_vm0, %v678_v3  ;;  %275 = vst.msk [vmem:[#allocation4 + $0x8] sm:$0xff] (!%p506_p13), %vm269_vm0, %v678_v3 }
  0x31 PF: > { %v513_v4 = vld [vmem:[%s212_s9] sm:$0xff]   ;;  %v679_v7 = vmov 0   ;;  %v796_v8 = vld [vmem:[%s787_s5] sm:$0xff]  ;;  %vm346_vm1 = vcmask 7168   ;;  %v812_v17 = vld [vmem:[%s787_s5 + $0x8] sm:$0xff]  ;;  %v279_v18 = vlaneseq  ;;  %s507_s12 = sshll.u32 %s651_s11, 7 }
  0x32   : > { %v514_v5 = vunpack.c.l.bf16 %v513_v4  ;;  %v515_v6 = vunpack.c.h.bf16 %v513_v4  ;;  %591 = vset.pattern.permute.xlu1 %v679_v7  ;;  %592 = vset.pattern.permute.xlu0 %v679_v7  ;;  %v281_v9 = vld [vmem:[#allocation2] sm:$0xff]  ;;  %v282_v12 = vld [vmem:[#allocation2 + $0x8] sm:$0xff]  ;;  %v292_v20 = vstv %s507_s12  ;;  %p508_p0 = scmp.ne.s32.totalorder %s651_s11, 1 }
  0x33   : > { %v280_v19 = vand.u32 127, %v279_v18  ;;  %v283_v40 = vld [vmem:[#allocation3] sm:$0xff]  ;;  %v284_v44 = vld [vmem:[#allocation3 + $0x8] sm:$0xff]  ;;  %vm365_vm4 = vcmp.ne.s32.totalorder (!%p508_p0), %v796_v8, 4294967196  ;;  %vm366_vm5 = vcmp.ne.s32.totalorder (!%p508_p0), %v812_v17, 4294967196 }
  0x34   : > { %294 = vmax.xlane.f32.xlu0 %v514_v5  ;;  %v285_v34 = vld [vmem:[#allocation4] sm:$0xff]  ;;  %v286_v49 = vld [vmem:[#allocation4 + $0x8] sm:$0xff] }
  0x35   : > { %v293_v21 = vadd.s32 %v292_v20, %v280_v19 }
  0x38   : > { %296 = vmax.xlane.f32.xlu0 %v515_v6 }
  0x4e   : > { %331 = vperm.xlu0 %592, %v796_v8  }
  0xc1   : > { %v295_v10 = vpop.xlane.xlu0 %294 }
  0xc2   : > { %v799_v11 = vmax.f32 %v281_v9, %v295_v10 }
  0xc4   : > { %v300_v13 = vsub.f32 %v281_v9, %v799_v11  ;;  %347 = vst.msk [vmem:[#allocation2] sm:$0xff] %vm346_vm1, %v799_v11  ;;  %308 = vperm.xlu1 %591, %v799_v11  }
  0xc5   : > { %v297_v14 = vpop.xlane.xlu0 %296 }
  0xc6   : > { %v805_v15 = vmax.f32 %v282_v12, %v297_v14  ;;  %v302_v37 = vmul.f32 1.442695, %v300_v13 }
  0xc8   : > { %v301_v16 = vsub.f32 %v282_v12, %v805_v15  ;;  %348 = vst.msk [vmem:[#allocation2 + $0x8] sm:$0xff] %vm346_vm1, %v805_v15  ;;  %313 = vperm.xlu1 %591, %v805_v15  }
  0xca   : > { %v304_v38 = vmul.f32 1.442695, %v301_v16 }
  0xcc   : > { %334 = vperm.xlu1 %591, %v812_v17  }
  0xcd   : > { %v332_v22 = vpop.permute.xlu0 %331 }
  0xce   : > { %vm336_vm2 = vcmp.eq.s32.totalorder %v293_v21, %v332_v22 }
  0xcf   : > { %v338_v23 = vsel %vm336_vm2, %v514_v5, 0.0 }
  0xd0   : > { %340 = vadd.xlane.f32.xlu0 %v338_v23 }
 0x143   : > { %v309_v24 = vpop.permute.xlu1 %308 }
 0x144   : > { %v316_v25 = vsub.f32 %v514_v5, %v309_v24 }
 0x146   : > { %v318_v26 = vmul.f32 1.442695, %v316_v25 }
 0x147   : > { %v314_v27 = vpop.permute.xlu1 %313 }
 0x148   : > { %593 = vpow2.f32 %v318_v26  ;;  %v317_v28 = vsub.f32 %v515_v6, %v314_v27 }
 0x14a   : > { %v320_v29 = vmul.f32 1.442695, %v317_v28 }
 0x14b   : > { %v335_v31 = vpop.permute.xlu1 %334 }
 0x14c   : > { %595 = vpow2.f32 %v320_v29  ;;  %vm337_vm3 = vcmp.eq.s32.totalorder %v293_v21, %v335_v31 }
 0x14d   : > { %v339_v33 = vsel %vm337_vm3, %v515_v6, 0.0  ;;  %597 = vpow2.f32 %v302_v37 }
 0x14e   : > { %599 = vpow2.f32 %v304_v38 }
 0x152   : > { %v594_v30 = vpop.eup %593 }
 0x153   : > { %322 = vadd.xlane.f32.xlu1 %v594_v30 }
 0x156   : > { %v596_v32 = vpop.eup %595 }
 0x157   : > { %324 = vadd.xlane.f32.xlu1 %v596_v32  ;;  %v598_v39 = vpop.eup %597 }
 0x158   : > { %v326_v41 = vmul.f32 %v598_v39, %v283_v40  ;;  %v600_v42 = vpop.eup %599 }
 0x159   : > { %v327_v46 = vmul.f32 %v600_v42, %v284_v44 }
 0x15b   : > { %342 = vadd.xlane.f32.xlu1 %v339_v33 }
 0x15d   : > { %v341_v35 = vpop.xlane.xlu0 %340 }
 0x15e   : > { %v344_v36 = vadd.f32 %v341_v35, %v285_v34 }
 0x160   : > { %351 = vst.msk [vmem:[#allocation4] sm:$0xff] %vm346_vm1, %v344_v36 }
 0x1e0   : > { %v323_v43 = vpop.xlane.xlu1 %322 }
 0x1e1   : > { %v328_v45 = vadd.f32 %v326_v41, %v323_v43 }
 0x1e3   : > { %349 = vst.msk [vmem:[#allocation3] sm:$0xff] %vm346_vm1, %v328_v45  ;;  %601 = vlog2.f32 (!%p508_p0), %v328_v45 }
 0x1e4   : > { %v325_v47 = vpop.xlane.xlu1 %324 }
 0x1e5   : > { %v329_v48 = vadd.f32 %v327_v46, %v325_v47  ;;  %356 = sbr.rel (%p508_p0) target bundleno = 506 (0x1fa), region = 77 }
 0x1e7   : > { %350 = vst.msk [vmem:[#allocation3 + $0x8] sm:$0xff] %vm346_vm1, %v329_v48  ;;  %603 = vlog2.f32 (!%p508_p0), %v329_v48 }
 0x1e8   : > { %v343_v50 = vpop.xlane.xlu1 %342 }
 0x1e9   : > { %v345_v51 = vadd.f32 %v343_v50, %v286_v49 }
 0x1eb   : > { %352 = vst.msk [vmem:[#allocation4 + $0x8] sm:$0xff] %vm346_vm1, %v345_v51 }
 0x1ed   : > { %v602_v52 = vpop.eup %601 }
 0x1ee   : > { %v358_v54 = vmul.f32 0.6931472, %v602_v52 }
 0x1f0   : > { %v361_v56 = vadd.f32 %v358_v54, %v799_v11 }
 0x1f1   : > { %v604_v53 = vpop.eup %603 }
 0x1f2   : > { %v360_v55 = vmul.f32 0.6931472, %v604_v53  ;;  %v363_v58 = vsub.f32 %v361_v56, %v344_v36 }
 0x1f4   : > { %v362_v57 = vadd.f32 %v360_v55, %v805_v15  ;;  %v367_v60 = vsel %vm365_vm4, %v363_v58, 0.0 }
 0x1f5   : > { %369 = vst.msk [vmem:[%s792_s8] sm:$0xff] %vm346_vm1, %v367_v60 }
 0x1f6   : > { %v364_v59 = vsub.f32 %v362_v57, %v345_v51 }
 0x1f8   : > { %v368_v61 = vsel %vm366_vm5, %v364_v59, 0.0 }
 0x1f9   : > { %370 = vst.msk [vmem:[%s792_s8 + $0x8] sm:$0xff] %vm346_vm1, %v368_v61 }
 0x1fa PF: > { %s12_s17 = sadd.s32 1, %s675_s17   ;;  %s860_s9 = smov %s647_s10 }
 0x1fb   : > { %p9_p1 = scmp.ge.s32.totalorder %s12_s17, 10   ;;  %s861_s10 = smov %s766_s28 }
 0x1fc   : > { %s862_s11 = smov %s663_s14  ;;  %s863_s12 = smov %s667_s15 }
 0x1fd   : > { %s864_s13 = smov %s671_s16  ;;  %s865_s14 = smov %s875_s18 }
 0x1fe   : > { %s866_s15 = smov %s871_s19  ;;  %s867_s16 = smov %s877_s20 }
 0x1ff   :  { %11 = sbr.rel (!%p9_p1) target bundleno = 5 (0x5), region = 115 }

</bundles_post_ra>
